<compile_context>
chip_gen: v5e
topology: v5e:2x2
jax: 0.10.0
libtpu: 0.0.40
codegen_flags: <defaults>
</compile_context>

<pallas_src>
import functools

import jax
import jax.numpy as jnp
from jax.experimental import pallas as pl
from jax.experimental.pallas import tpu as pltpu

D_IN = 784           # input features (full-array last dim, no pad needed)
H1 = 128
H2 = 256
D_OUT = 10           # logical output classes
D_OUT_PAD = 128      # lane-dense output store


def _round_up(x, m):
    return ((x + m - 1) // m) * m


def mlp_kernel(x_ref, w1_ref, b1_ref, w2_ref, b2_ref, w3_ref, b3_ref, o_ref):
    # x arrives as f32; cast to bf16 in-kernel for the fast MXU path.
    x = x_ref[...].astype(jnp.bfloat16)
    # hidden1 + relu (f32 accumulate, f32 bias/ReLU)
    h1 = jnp.dot(x, w1_ref[...], preferred_element_type=jnp.float32)
    h1 = jnp.maximum(h1 + b1_ref[...], 0.0)
    # hidden2 + relu
    h2 = jnp.dot(h1.astype(jnp.bfloat16), w2_ref[...],
                 preferred_element_type=jnp.float32)
    h2 = jnp.maximum(h2 + b2_ref[...], 0.0)
    # out (no activation, matches PyTorch forward); padded out columns are zero
    out = jnp.dot(h2.astype(jnp.bfloat16), w3_ref[...],
                  preferred_element_type=jnp.float32) + b3_ref[...]
    o_ref[...] = out.astype(o_ref.dtype)   # bf16 store (lane-dense, half the bytes)


def prepare_params(params):
    """One-time glue (call once, outside the per-forward path).

    PyTorch nn.Linear weights are [out, in]; transpose to [in, out], cast to
    bf16, and pad the last layer's out-dim 10 -> 128 so the kernel's stores
    stay lane-dense.
    """
    w1 = jnp.asarray(params["w1"]).T.astype(jnp.bfloat16)                 # [784, 128]
    b1 = jnp.asarray(params["b1"]).reshape(1, H1).astype(jnp.float32)
    w2 = jnp.asarray(params["w2"]).T.astype(jnp.bfloat16)                 # [128, 256]
    b2 = jnp.asarray(params["b2"]).reshape(1, H2).astype(jnp.float32)
    w3 = jnp.pad(jnp.asarray(params["w3"]),
                 ((0, D_OUT_PAD - D_OUT), (0, 0))).T.astype(jnp.bfloat16)  # [256, 128]
    b3 = jnp.pad(jnp.asarray(params["b3"]),
                 (0, D_OUT_PAD - D_OUT)).reshape(1, D_OUT_PAD).astype(jnp.float32)
    return (w1, b1, w2, b2, w3, b3)


@functools.partial(jax.jit, static_argnames=("tb",))
def mnist_nn_forward(x, prepared, *, tb=1024):
    """x: [B, 784] float32. prepared: output of prepare_params().

    Returns [B, 10] float32 logits.
    """
    B, D = x.shape
    assert D == D_IN
    w1, b1, w2, b2, w3, b3 = prepared

    # Batch tile: multiple of 8, capped so the parallel grid axis has >= 2 steps
    # whenever B allows it (keeps both v7x TensorCores busy); never bigger than tb.
    tb_eff = max(8, min(tb, _round_up(pl.cdiv(B, 2), 8)))
    grid = (pl.cdiv(B, tb_eff),)   # no batch padding; Pallas clips the partial tail block

    full = lambda i: (0, 0)        # weights/biases resident (block == full array)

    flops = 2 * B * (D_IN * H1 + H1 * H2 + H2 * D_OUT_PAD)
    bytes_accessed = (
        B * D_IN * 4                                      # x (f32 read, dominant stream)
        + (D_IN * H1 + H1 * H2 + H2 * D_OUT_PAD) * 2      # weights (bf16)
        + (H1 + H2 + D_OUT_PAD) * 4                       # biases (f32)
        + B * D_OUT_PAD * 2                               # output (bf16)
    )

    out = pl.pallas_call(
        mlp_kernel,
        out_shape=jax.ShapeDtypeStruct((B, D_OUT_PAD), jnp.bfloat16),
        grid_spec=pltpu.PrefetchScalarGridSpec(
            num_scalar_prefetch=0,
            grid=grid,
            in_specs=[
                # x tile; last dim == full array dim (784) satisfies the (8,128) rule.
                # (Optionally deepen to pl.Buffered(3) once bytes are the only limiter.)
                pl.BlockSpec((tb_eff, D_IN), lambda i: (i, 0)),
                pl.BlockSpec((D_IN, H1), full),
                pl.BlockSpec((1, H1), full),
                pl.BlockSpec((H1, H2), full),
                pl.BlockSpec((1, H2), full),
                pl.BlockSpec((H2, D_OUT_PAD), full),
                pl.BlockSpec((1, D_OUT_PAD), full),
            ],
            out_specs=pl.BlockSpec((tb_eff, D_OUT_PAD), lambda i: (i, 0)),
        ),
        compiler_params=pltpu.CompilerParams(
            dimension_semantics=("parallel",),
            vmem_limit_bytes=32 * 1024 * 1024,   # safe on v5e/v6e (128 MiB) and v7x (64 MiB)
        ),
        cost_estimate=pl.CostEstimate(
            flops=flops, transcendentals=0, bytes_accessed=bytes_accessed),
    )(x, w1, b1, w2, b2, w3, b3)

    # Strip class padding; widen to f32 only after the narrow slice.
    return out[:, :D_OUT].astype(jnp.float32)


def init_params(key):
    """Deterministic synthetic init; shapes follow nn.Linear (weight is [out, in])."""
    k1, k2, k3, k4, k5, k6 = jax.random.split(key, 6)
    return {
        "w1": jax.random.normal(k1, (H1, D_IN), jnp.float32) * 0.05,
        "b1": jax.random.normal(k2, (H1,), jnp.float32) * 0.05,
        "w2": jax.random.normal(k3, (H2, H1), jnp.float32) * 0.05,
        "b2": jax.random.normal(k4, (H2,), jnp.float32) * 0.05,
        "w3": jax.random.normal(k5, (D_OUT, H2), jnp.float32) * 0.05,
        "b3": jax.random.normal(k6, (D_OUT,), jnp.float32) * 0.05,
    }


def reference_forward(x, p):
    h1 = jax.nn.relu(x @ p["w1"].T + p["b1"])
    h2 = jax.nn.relu(h1 @ p["w2"].T + p["b2"])
    return h2 @ p["w3"].T + p["b3"]


if __name__ == "__main__":
    key = jax.random.PRNGKey(0)
    kx, kp = jax.random.split(key)

    B = 8
    x = jax.random.normal(kx, (B, D_IN), jnp.float32)
    params = init_params(kp)

    prepared = prepare_params(params)          # one-time param prep (hoisted glue)
    out = mnist_nn_forward(x, prepared)
    out = jax.block_until_ready(out)

    ref = reference_forward(x, params)
    assert out.shape == (B, D_OUT)
    # bf16 MXU path with f32 accumulation: compare against the f32 reference
    # with a bf16-appropriate tolerance.
    assert jnp.allclose(out, ref, atol=5e-2, rtol=5e-2), "mismatch vs pure-JAX reference"

    print("KERNEL_OK")
</pallas_src>

<mosaic_0001>
module attributes {stable_mosaic.version = 11 : i64} {
  func.func @mlp_kernel(%arg0: i32, %arg1: memref<8x784xf32, #tpu.memory_space<vmem>>, %arg2: memref<784x128xbf16, #tpu.memory_space<vmem>>, %arg3: memref<1x128xf32, #tpu.memory_space<vmem>>, %arg4: memref<128x256xbf16, #tpu.memory_space<vmem>>, %arg5: memref<1x256xf32, #tpu.memory_space<vmem>>, %arg6: memref<256x128xbf16, #tpu.memory_space<vmem>>, %arg7: memref<1x128xf32, #tpu.memory_space<vmem>>, %arg8: memref<8x128xbf16, #tpu.memory_space<vmem>>) attributes {dimension_semantics = [#tpu.dimension_semantics<parallel>], iteration_bounds = array<i64: 1>, scalar_prefetch = 0 : i64, scratch_operands = 0 : i64, tpu.core_type = #tpu.core_type<tc>, window_params = [{transform_indices = @transform_0, window_bounds = array<i64: 8, 784>}, {pipeline_mode = #tpu.pipeline_mode<synchronous>, transform_indices = @transform_1, window_bounds = array<i64: 784, 128>}, {pipeline_mode = #tpu.pipeline_mode<synchronous>, transform_indices = @transform_2, window_bounds = array<i64: 1, 128>}, {pipeline_mode = #tpu.pipeline_mode<synchronous>, transform_indices = @transform_3, window_bounds = array<i64: 128, 256>}, {pipeline_mode = #tpu.pipeline_mode<synchronous>, transform_indices = @transform_4, window_bounds = array<i64: 1, 256>}, {pipeline_mode = #tpu.pipeline_mode<synchronous>, transform_indices = @transform_5, window_bounds = array<i64: 256, 128>}, {pipeline_mode = #tpu.pipeline_mode<synchronous>, transform_indices = @transform_6, window_bounds = array<i64: 1, 128>}, {transform_indices = @transform_7, window_bounds = array<i64: 8, 128>}]} {
    %c0 = arith.constant 0 : index
    %c0_0 = arith.constant 0 : index
    %0 = vector.load %arg1[%c0, %c0_0] : memref<8x784xf32, #tpu.memory_space<vmem>>, vector<8x784xf32>
    %1 = arith.truncf %0 : vector<8x784xf32> to vector<8x784xbf16>
    %c0_1 = arith.constant 0 : index
    %c0_2 = arith.constant 0 : index
    %2 = vector.load %arg2[%c0_1, %c0_2] : memref<784x128xbf16, #tpu.memory_space<vmem>>, vector<784x128xbf16>
    %cst = arith.constant dense<0.000000e+00> : vector<8x128xf32>
    %3 = tpu.matmul %1, %2, %cst {dimension_numbers = #tpu.dot_dimension_numbers<[1], [0], [0], [1], [0, 0, 1, 1], [], []>} : vector<8x784xbf16>, vector<784x128xbf16>, vector<8x128xf32> -> vector<8x128xf32>
    %c0_3 = arith.constant 0 : index
    %c0_4 = arith.constant 0 : index
    %4 = vector.load %arg3[%c0_3, %c0_4] : memref<1x128xf32, #tpu.memory_space<vmem>>, vector<1x128xf32>
    %5 = vector.broadcast %4 : vector<1x128xf32> to vector<8x128xf32>
    %6 = arith.addf %3, %5 : vector<8x128xf32>
    %cst_5 = arith.constant 0.000000e+00 : f32
    %7 = vector.broadcast %cst_5 : f32 to vector<8x128xf32>
    %8 = arith.maximumf %6, %7 : vector<8x128xf32>
    %9 = arith.truncf %8 : vector<8x128xf32> to vector<8x128xbf16>
    %c0_6 = arith.constant 0 : index
    %c0_7 = arith.constant 0 : index
    %10 = vector.load %arg4[%c0_6, %c0_7] : memref<128x256xbf16, #tpu.memory_space<vmem>>, vector<128x256xbf16>
    %cst_8 = arith.constant dense<0.000000e+00> : vector<8x256xf32>
    %11 = tpu.matmul %9, %10, %cst_8 {dimension_numbers = #tpu.dot_dimension_numbers<[1], [0], [0], [1], [0, 0, 1, 1], [], []>} : vector<8x128xbf16>, vector<128x256xbf16>, vector<8x256xf32> -> vector<8x256xf32>
    %c0_9 = arith.constant 0 : index
    %c0_10 = arith.constant 0 : index
    %12 = vector.load %arg5[%c0_9, %c0_10] : memref<1x256xf32, #tpu.memory_space<vmem>>, vector<1x256xf32>
    %13 = vector.broadcast %12 : vector<1x256xf32> to vector<8x256xf32>
    %14 = arith.addf %11, %13 : vector<8x256xf32>
    %cst_11 = arith.constant 0.000000e+00 : f32
    %15 = vector.broadcast %cst_11 : f32 to vector<8x256xf32>
    %16 = arith.maximumf %14, %15 : vector<8x256xf32>
    %17 = arith.truncf %16 : vector<8x256xf32> to vector<8x256xbf16>
    %c0_12 = arith.constant 0 : index
    %c0_13 = arith.constant 0 : index
    %18 = vector.load %arg6[%c0_12, %c0_13] : memref<256x128xbf16, #tpu.memory_space<vmem>>, vector<256x128xbf16>
    %cst_14 = arith.constant dense<0.000000e+00> : vector<8x128xf32>
    %19 = tpu.matmul %17, %18, %cst_14 {dimension_numbers = #tpu.dot_dimension_numbers<[1], [0], [0], [1], [0, 0, 1, 1], [], []>} : vector<8x256xbf16>, vector<256x128xbf16>, vector<8x128xf32> -> vector<8x128xf32>
    %c0_15 = arith.constant 0 : index
    %c0_16 = arith.constant 0 : index
    %20 = vector.load %arg7[%c0_15, %c0_16] : memref<1x128xf32, #tpu.memory_space<vmem>>, vector<1x128xf32>
    %21 = vector.broadcast %20 : vector<1x128xf32> to vector<8x128xf32>
    %22 = arith.addf %19, %21 : vector<8x128xf32>
    %23 = arith.truncf %22 : vector<8x128xf32> to vector<8x128xbf16>
    %c0_17 = arith.constant 0 : index
    %c0_18 = arith.constant 0 : index
    %24 = vector.load %arg8[%c0_17, %c0_18] : memref<8x128xbf16, #tpu.memory_space<vmem>>, vector<8x128xbf16>
    tpu.vector_store %arg8[%c0_17, %c0_18], %23 {strides = array<i32>} : memref<8x128xbf16, #tpu.memory_space<vmem>>, vector<8x128xbf16>,
    return
  }
  func.func @transform_0(%arg0: i32) -> (i32, i32) {
    %c0_i32 = arith.constant 0 : i32
    %c0_i32_0 = arith.constant 0 : i32
    return %arg0, %c0_i32 : i32, i32
  }
  func.func @transform_1(%arg0: i32) -> (i32, i32) {
    %c0_i32 = arith.constant 0 : i32
    %c0_i32_0 = arith.constant 0 : i32
    %c0_i32_1 = arith.constant 0 : i32
    return %c0_i32, %c0_i32_0 : i32, i32
  }
  func.func @transform_2(%arg0: i32) -> (i32, i32) {
    %c0_i32 = arith.constant 0 : i32
    %c0_i32_0 = arith.constant 0 : i32
    %c0_i32_1 = arith.constant 0 : i32
    return %c0_i32, %c0_i32_0 : i32, i32
  }
  func.func @transform_3(%arg0: i32) -> (i32, i32) {
    %c0_i32 = arith.constant 0 : i32
    %c0_i32_0 = arith.constant 0 : i32
    %c0_i32_1 = arith.constant 0 : i32
    return %c0_i32, %c0_i32_0 : i32, i32
  }
  func.func @transform_4(%arg0: i32) -> (i32, i32) {
    %c0_i32 = arith.constant 0 : i32
    %c0_i32_0 = arith.constant 0 : i32
    %c0_i32_1 = arith.constant 0 : i32
    return %c0_i32, %c0_i32_0 : i32, i32
  }
  func.func @transform_5(%arg0: i32) -> (i32, i32) {
    %c0_i32 = arith.constant 0 : i32
    %c0_i32_0 = arith.constant 0 : i32
    %c0_i32_1 = arith.constant 0 : i32
    return %c0_i32, %c0_i32_0 : i32, i32
  }
  func.func @transform_6(%arg0: i32) -> (i32, i32) {
    %c0_i32 = arith.constant 0 : i32
    %c0_i32_0 = arith.constant 0 : i32
    %c0_i32_1 = arith.constant 0 : i32
    return %c0_i32, %c0_i32_0 : i32, i32
  }
  func.func @transform_7(%arg0: i32) -> (i32, i32) {
    %c0_i32 = arith.constant 0 : i32
    %c0_i32_0 = arith.constant 0 : i32
    return %arg0, %c0_i32 : i32, i32
  }
}

</mosaic_0001>

<bundles_post_ra>
// kernel: mnist_nn_forward.1
= control target key start
LH: loop header
LB: loop body
LE: loop exit
PB: predicated region body
PF: predicated region fallthrough
CT: control target
= control target key end

     0   :  { %12 = vsyncpa [#allocation3], 0  ;;  %s1484_s0 = inlined_call_operand.hbm [shape: f32[8,784], index: 0, kind: input, shape index: {}]   ;;  %s1485_s1 = inlined_call_operand.hbm [shape: bf16[784,128], index: 1, kind: input, shape index: {}]   ;;  %s1486_s2 = inlined_call_operand.vmem [shape: f32[1,128], index: 2, kind: input, shape index: {}]   ;;  %s1487_s3 = inlined_call_operand.hbm [shape: bf16[128,256], index: 3, kind: input, shape index: {}]   ;;  %s1488_s4 = inlined_call_operand.vmem [shape: f32[1,256], index: 4, kind: input, shape index: {}]   ;;  %s1489_s5 = inlined_call_operand.hbm [shape: bf16[256,128], index: 5, kind: input, shape index: {}]   ;;  %s1490_s6 = inlined_call_operand.vmem [shape: f32[1,128], index: 6, kind: input, shape index: {}]   ;;  %s1491_s7 = inlined_call_operand.vmem [shape: bf16[8,128], index: 7, kind: output, shape index: {}]  }
   0x1   :  { %13 = vsyncpa [#allocation5], 0  ;;  %s30_s26 = sshll.u32 %s1485_s1, 4  ;;  %s31_s26 = int_to_ptr.hbm [resolvable:$true] %s30_s26 }
   0x2   :  { %14 = vsyncpa [#allocation8], 0  ;;  %s1412_s27 = smov [#allocation4]   ;;  %s20_s8 = sshll.u32 %s1484_s0, 4  ;;  %s21_s8 = int_to_ptr.hbm [resolvable:$true] %s20_s8 }
   0x3   :  { %s32_s28 = sshll.u32 %s1412_s27, 4  ;;  %s1413_s9 = smov 64   ;;  %s33_s28 = int_to_ptr.vmem [resolvable:$true] %s32_s28 }
   0x4   :  { %s1414_s10 = smov 4   ;;  %s1415_s11 = smov [#allocation2]  }
   0x5   :  { %38 = dma.hbm_to_vmem [thread:$0]  %s31_s26, 6272, %s33_s28, [#allocation5], %s1413_s9, %s1413_s9, %s1414_s10  }
   0x6   :  { %s22_s12 = sshll.u32 %s1415_s11, 4  ;;  %s45_s15 = sshll.u32 %s1487_s3, 4  ;;  %s23_s12 = int_to_ptr.vmem [resolvable:$true] %s22_s12  ;;  %s46_s15 = int_to_ptr.hbm [resolvable:$true] %s45_s15 }
   0x7   :  { %25 = dma.hbm_to_vmem [thread:$0]  %s21_s8, 896, %s23_s12, [#allocation3]  }
   0x8   :  { %s1416_s1 = smov [#allocation6]   ;;  %s60_s0 = sshll.u32 %s1489_s5, 4  ;;  %s61_s0 = int_to_ptr.hbm [resolvable:$true] %s60_s0 }
   0x9   :  { %s47_s16 = sshll.u32 %s1416_s1, 4  ;;  %s1417_s19 = smov 128   ;;  %s48_s16 = int_to_ptr.vmem [resolvable:$true] %s47_s16 }
   0xa   :  { %s1418_s20 = smov 8   ;;  %s1419_s21 = smov [#allocation7]  }
   0xb   :  { %53 = dma.hbm_to_vmem [thread:$0]  %s46_s15, 2048, %s48_s16, [#allocation5], %s1417_s19, %s1417_s19, %s1418_s20  }
   0xc   :  { %s62_s22 = sshll.u32 %s1419_s21, 4  ;;  %s63_s22 = int_to_ptr.vmem [resolvable:$true] %s62_s22 }
   0xd   :  { %68 = dma.hbm_to_vmem [thread:$0]  %s61_s0, 2048, %s63_s22, [#allocation8], %s1413_s9, %s1413_s9, %s1414_s10  }
   0xe   :  { %1406 = dma.done.wait [#allocation3], 896  }
   0xf   :  { %1407 = vsyncadd [#allocation3], 4294966400 }
  0x10   :  { %1408 = dma.done.wait [#allocation5], 8320  }
  0x11   :  { %1409 = vsyncadd [#allocation5], 4294958976 }
  0x12   :  { %1410 = dma.done.wait [#allocation8], 2048  }
  0x13   :  { %1411 = vsyncadd [#allocation8], 4294965248  ;;  %v1226_v0 = vld [vmem:[#allocation4 + $0x38] sm:$0xff]  ;;  %v1225_v3 = vld [vmem:[#allocation4 + $0x30] sm:$0xff]  ;;  %vm498_vm0 = vcmask 130048  }
  0x14   :  { %v1234_v1 = vld [vmem:[#allocation4 + $0x78] sm:$0xff]  ;;  %502 = vmatpush.bf16.msra.mxu0 %v1226_v0  ;;  %v1233_v4 = vld [vmem:[#allocation4 + $0x70] sm:$0xff]  ;;  %v1224_v8 = vld [vmem:[#allocation4 + $0x28] sm:$0xff] }
  0x15   :  { %v1242_v2 = vld [vmem:[#allocation4 + $0xb8] sm:$0xff]  ;;  %515 = vmatpush.bf16.msra.mxu1 %v1234_v1  ;;  %v1241_v5 = vld [vmem:[#allocation4 + $0xb0] sm:$0xff]  ;;  %v1232_v9 = vld [vmem:[#allocation4 + $0x68] sm:$0xff] }
  0x16   :  { %528 = vmatpush.bf16.msra.mxu2 %v1242_v2  ;;  %v1250_v6 = vld [vmem:[#allocation4 + $0xf8] sm:$0xff]  ;;  %v1249_v7 = vld [vmem:[#allocation4 + $0xf0] sm:$0xff]  ;;  %v1240_v10 = vld [vmem:[#allocation4 + $0xa8] sm:$0xff] }
  0x17   :  { %541 = vmatpush.bf16.msra.mxu3 %v1250_v6  ;;  %v1248_v11 = vld [vmem:[#allocation4 + $0xe8] sm:$0xff]  ;;  %v1223_v12 = vld [vmem:[#allocation4 + $0x20] sm:$0xff]  ;;  %v1222_v16 = vld [vmem:[#allocation4 + $0x18] sm:$0xff] }
  0x18   :  { %503 = vmatpush.bf16.msra.mxu0 %v1225_v3  ;;  %v1231_v13 = vld [vmem:[#allocation4 + $0x60] sm:$0xff]  ;;  %v1230_v17 = vld [vmem:[#allocation4 + $0x58] sm:$0xff]  ;;  %v1221_v20 = vld [vmem:[#allocation4 + $0x10] sm:$0xff] }
  0x19   :  { %516 = vmatpush.bf16.msra.mxu1 %v1233_v4  ;;  %v1239_v14 = vld [vmem:[#allocation4 + $0xa0] sm:$0xff]  ;;  %v1238_v18 = vld [vmem:[#allocation4 + $0x98] sm:$0xff]  ;;  %v1229_v21 = vld [vmem:[#allocation4 + $0x50] sm:$0xff] }
  0x1a   :  { %529 = vmatpush.bf16.msra.mxu2 %v1241_v5  ;;  %v1247_v15 = vld [vmem:[#allocation4 + $0xe0] sm:$0xff]  ;;  %v1246_v19 = vld [vmem:[#allocation4 + $0xd8] sm:$0xff]  ;;  %v1237_v22 = vld [vmem:[#allocation4 + $0x90] sm:$0xff] }
  0x1b   :  { %542 = vmatpush.bf16.msra.mxu3 %v1249_v7  ;;  %v1245_v23 = vld [vmem:[#allocation4 + $0xd0] sm:$0xff]  ;;  %v1220_v24 = vld [vmem:[#allocation4 + $0x8] sm:$0xff]  ;;  %v1219_v27 = vld [vmem:[#allocation4] sm:$0xff] }
  0x1c   :  { %504 = vmatpush.bf16.msra.mxu0 %v1224_v8  ;;  %v1228_v25 = vld [vmem:[#allocation4 + $0x48] sm:$0xff]  ;;  %v1227_v29 = vld [vmem:[#allocation4 + $0x40] sm:$0xff]  ;;  %v89_v31 = vld [vmem:[#allocation2 + $0x8] sm:$0xff] }
  0x1d   :  { %517 = vmatpush.bf16.msra.mxu1 %v1232_v9  ;;  %v1236_v26 = vld [vmem:[#allocation4 + $0x88] sm:$0xff]  ;;  %v1258_v32 = vld [vmem:[#allocation4 + $0x138] sm:$0xff]  ;;  %v1235_v34 = vld [vmem:[#allocation4 + $0x80] sm:$0xff]  ;;  %v96_v37 = vpack.c.bf16 %v89_v31, %v89_v31 }
  0x1e   :  { %530 = vmatpush.bf16.msra.mxu2 %v1240_v10  ;;  %v1244_v28 = vld [vmem:[#allocation4 + $0xc8] sm:$0xff]  ;;  %v1266_v33 = vld [vmem:[#allocation4 + $0x178] sm:$0xff]  ;;  %v1243_v38 = vld [vmem:[#allocation4 + $0xc0] sm:$0xff] }
  0x1f   :  { %543 = vmatpush.bf16.msra.mxu3 %v1248_v11  ;;  %v88_v30 = vld [vmem:[#allocation2] sm:$0xff]  ;;  %v90_v35 = vld [vmem:[#allocation2 + $0x10] sm:$0xff]  ;;  %v1267_v39 = vld [vmem:[#allocation4 + $0x180] sm:$0xff] }
  0x20   :  { %505 = vmatpush.bf16.msra.mxu0 %v1223_v12  ;;  %v95_v36 = vpack.c.bf16 %v88_v30, %v88_v30  ;;  %v91_v40 = vld [vmem:[#allocation2 + $0x18] sm:$0xff]  ;;  %v1257_v41 = vld [vmem:[#allocation4 + $0x130] sm:$0xff]  ;;  %v97_v43 = vpack.c.bf16 %v90_v35, %v90_v35  ;;  %v1256_v45 = vld [vmem:[#allocation4 + $0x128] sm:$0xff] }
  0x21   :  { %518 = vmatpush.bf16.msra.mxu1 %v1231_v13  ;;  %v1265_v42 = vld [vmem:[#allocation4 + $0x170] sm:$0xff]  ;;  %v98_v44 = vpack.c.bf16 %v91_v40, %v91_v40  ;;  %v1264_v46 = vld [vmem:[#allocation4 + $0x168] sm:$0xff]  ;;  %v1255_v47 = vld [vmem:[#allocation4 + $0x120] sm:$0xff] }
  0x22   :  { %531 = vmatpush.bf16.msra.mxu2 %v1239_v14  ;;  %v1263_v48 = vld [vmem:[#allocation4 + $0x160] sm:$0xff]  ;;  %v1254_v49 = vld [vmem:[#allocation4 + $0x118] sm:$0xff]  ;;  %v1253_v52 = vld [vmem:[#allocation4 + $0x110] sm:$0xff] }
  0x23   :  { %544 = vmatpush.bf16.msra.mxu3 %v1247_v15  ;;  %v1262_v50 = vld [vmem:[#allocation4 + $0x158] sm:$0xff]  ;;  %v1261_v53 = vld [vmem:[#allocation4 + $0x150] sm:$0xff]  ;;  %v1252_v55 = vld [vmem:[#allocation4 + $0x108] sm:$0xff] }
  0x24   :  { %506 = vmatpush.bf16.msra.mxu0 %v1222_v16  ;;  %v94_v51 = vld [vmem:[#allocation2 + $0x30] sm:$0xff]  ;;  %v1260_v56 = vld [vmem:[#allocation4 + $0x148] sm:$0xff]  ;;  %v1251_v57 = vld [vmem:[#allocation4 + $0x100] sm:$0xff] }
  0x25   :  { %519 = vmatpush.bf16.msra.mxu1 %v1230_v17  ;;  %v101_v54 = vpack.c.bf16 %v94_v51, %v94_v51  ;;  %v1259_v58 = vld [vmem:[#allocation4 + $0x140] sm:$0xff]  ;;  %v92_v59 = vld [vmem:[#allocation2 + $0x20] sm:$0xff]  ;;  %v93_v60 = vld [vmem:[#allocation2 + $0x28] sm:$0xff] }
  0x26   :  { %532 = vmatpush.bf16.msra.mxu2 %v1238_v18  ;;  %v99_v61 = vpack.c.bf16 %v92_v59, %v92_v59  ;;  %v100_v62 = vpack.c.bf16 %v93_v60, %v93_v60  ;;  %v1149_v63 = vld [vmem:[#allocation6 + $0x70] sm:$0xf]  ;;  %v1283_v0 = vld [vmem:[#allocation6 + $0x74] sm:$0xf0]  ;;  %v1282_v1 = vld [vmem:[#allocation6 + $0x74] sm:$0xf] }
  0x27   :  { %545 = vmatpush.bf16.msra.mxu3 %v1246_v19  ;;  %v1150_v2 = vor.u32 %v1283_v0, %v1149_v63  ;;  %v1151_v3 = vld [vmem:[#allocation6 + $0x78] sm:$0xf0]  ;;  %v1141_v5 = vld [vmem:[#allocation6 + $0x60] sm:$0xf]  ;;  %v1281_v6 = vld [vmem:[#allocation6 + $0x64] sm:$0xf0] }
  0x28   :  { %507 = vmatpush.bf16.msra.mxu0 %v1221_v20  ;;  %v1154_v4 = vor.u32 %v1282_v1, %v1151_v3  ;;  %v1280_v7 = vld [vmem:[#allocation6 + $0x64] sm:$0xf]  ;;  %v1142_v8 = vor.u32 %v1281_v6, %v1141_v5  ;;  %v1143_v9 = vld [vmem:[#allocation6 + $0x68] sm:$0xf0]  ;;  %v1133_v11 = vld [vmem:[#allocation6 + $0x50] sm:$0xf] }
  0x29   :  { %520 = vmatpush.bf16.msra.mxu1 %v1229_v21  ;;  %v1146_v10 = vor.u32 %v1280_v7, %v1143_v9  ;;  %v1279_v12 = vld [vmem:[#allocation6 + $0x54] sm:$0xf0]  ;;  %v1278_v13 = vld [vmem:[#allocation6 + $0x54] sm:$0xf]  ;;  %v1135_v15 = vld [vmem:[#allocation6 + $0x58] sm:$0xf0] }
  0x2a   :  { %533 = vmatpush.bf16.msra.mxu2 %v1237_v22  ;;  %v1134_v14 = vor.u32 %v1279_v12, %v1133_v11  ;;  %v1138_v16 = vor.u32 %v1278_v13, %v1135_v15  ;;  %v1125_v17 = vld [vmem:[#allocation6 + $0x40] sm:$0xf]  ;;  %v1277_v18 = vld [vmem:[#allocation6 + $0x44] sm:$0xf0]  ;;  %v1276_v19 = vld [vmem:[#allocation6 + $0x44] sm:$0xf] }
  0x2b   :  { %546 = vmatpush.bf16.msra.mxu3 %v1245_v23  ;;  %v1126_v20 = vor.u32 %v1277_v18, %v1125_v17  ;;  %v1127_v21 = vld [vmem:[#allocation6 + $0x48] sm:$0xf0]  ;;  %v1117_v23 = vld [vmem:[#allocation6 + $0x30] sm:$0xf]  ;;  %v1273_v30 = vld [vmem:[#allocation6 + $0x24] sm:$0xf0] }
  0x2c   :  { %508 = vmatpush.bf16.msra.mxu0 %v1220_v24  ;;  %v1130_v22 = vor.u32 %v1276_v19, %v1127_v21  ;;  %v1275_v24 = vld [vmem:[#allocation6 + $0x34] sm:$0xf0]  ;;  %v1272_v31 = vld [vmem:[#allocation6 + $0x24] sm:$0xf]  ;;  %v1101_v35 = vld [vmem:[#allocation6 + $0x10] sm:$0xf] }
  0x2d   :  { %521 = vmatpush.bf16.msra.mxu1 %v1228_v25  ;;  %v1274_v25 = vld [vmem:[#allocation6 + $0x34] sm:$0xf]  ;;  %v1291_v51 = vld [vmem:[#allocation7 + $0x38] sm:$0xff]  ;;  %v1297_v59 = vld [vmem:[#allocation7 + $0x68] sm:$0xff] }
  0x2e   :  { %534 = vmatpush.bf16.msra.mxu2 %v1236_v26  ;;  %v1118_v26 = vor.u32 %v1275_v24, %v1117_v23  ;;  %v1288_v63 = vld [vmem:[#allocation7 + $0x20] sm:$0xff]  ;;  %v1295_v3 = vld [vmem:[#allocation7 + $0x58] sm:$0xff]  ;;  %v1286_v6 = vld [vmem:[#allocation7 + $0x10] sm:$0xff] }
  0x2f   :  { %547 = vmatpush.bf16.msra.mxu3 %v1244_v28  ;;  %v1296_v0 = vld [vmem:[#allocation7 + $0x60] sm:$0xff]  ;;  %v1294_v7 = vld [vmem:[#allocation7 + $0x50] sm:$0xff]  ;;  %v1285_v19 = vld [vmem:[#allocation7 + $0x8] sm:$0xff] }
  0x30   :  { %509 = vmatpush.bf16.msra.mxu0 %v1219_v27  ;;  %v1119_v27 = vld [vmem:[#allocation6 + $0x38] sm:$0xf0]  ;;  %v1284_v21 = vld [vmem:[#allocation7] sm:$0xff] }
  0x31   :  { %522 = vmatpush.bf16.msra.mxu1 %v1227_v29  ;;  %v1122_v28 = vor.u32 %v1274_v25, %v1119_v27  ;;  %v1109_v29 = vld [vmem:[#allocation6 + $0x20] sm:$0xf] }
  0x32   :  { %535 = vmatpush.bf16.msra.mxu2 %v1235_v34  ;;  %v611_v23 = vld [vmem:[%s1488_s4] sm:$0x3] }
  0x33   :  { %510 = vmatmul.bf16.vlgmr.msra.gmra.mxu0 %v95_v36  ;;  %548 = vmatpush.bf16.msra.mxu3 %v1243_v38  ;;  %v1271_v36 = vld [vmem:[#allocation6 + $0x14] sm:$0xf0]  ;;  %v613_v24 = vperm.slane %v611_v23, 0  ;;  %v614_v25 = vperm.slane %v611_v23, 1 }
  0x34   :  { %554 = vmatpush.bf16.msrb.mxu0 %v1258_v32  ;;  %523 = vmatmul.bf16.vlgmr.msra.gmra.mxu1 %v96_v37  ;;  %v1110_v32 = vor.u32 %v1273_v30, %v1109_v29  ;;  %v1270_v37 = vld [vmem:[#allocation6 + $0x14] sm:$0xf]  ;;  %v1102_v38 = vor.u32 %v1271_v36, %v1101_v35  ;;  %v1309_v36 = vld [vmem:[%s1490_s6] ss:$0 sm:$0xff] }
  0x35   :  { %567 = vmatpush.bf16.msrb.mxu1 %v1266_v33  ;;  %536 = vmatmul.bf16.vlgmr.msra.gmra.mxu2 %v97_v43  ;;  %v1111_v33 = vld [vmem:[#allocation6 + $0x28] sm:$0xf0]  ;;  %v1093_v43 = vld [vmem:[#allocation6] sm:$0xf] }
  0x36   :  { %587 = vmatpush.bf16.msrb.mxu2 %v1267_v39  ;;  %549 = vmatmul.bf16.vlgmr.msra.gmra.mxu3 %v98_v44  ;;  %v1114_v34 = vor.u32 %v1272_v31, %v1111_v33  ;;  %v1103_v39 = vld [vmem:[#allocation6 + $0x18] sm:$0xf0]  ;;  %v1269_v44 = vld [vmem:[#allocation6 + $0x4] sm:$0xf0] }
  0x37   :  { %697 = vmatpush.bf16.msrb.mxu3 %v1150_v2  ;;  %v1287_v2 = vld [vmem:[#allocation7 + $0x18] sm:$0xff] }
  0x38   :  { %555 = vmatpush.bf16.msrb.mxu0 %v1257_v41 }
  0x39   :  { %568 = vmatpush.bf16.msrb.mxu1 %v1265_v42  ;;  %v1106_v42 = vor.u32 %v1270_v37, %v1103_v39 }
  0x3a   :  { %710 = vmatpush.bf16.msra.mxu2 %v1154_v4 }
  0x3b   :  { %698 = vmatpush.bf16.msrb.mxu3 %v1142_v8 }
  0x3c   :  { %556 = vmatpush.bf16.msrb.mxu0 %v1256_v45  ;;  %v1268_v45 = vld [vmem:[#allocation6 + $0x4] sm:$0xf] }
  0x3d   :  { %569 = vmatpush.bf16.msrb.mxu1 %v1264_v46  ;;  %v1094_v46 = vor.u32 %v1269_v44, %v1093_v43 }
  0x3e   :  { %711 = vmatpush.bf16.msra.mxu2 %v1146_v10 }
  0x3f   :  { %699 = vmatpush.bf16.msrb.mxu3 %v1134_v14 }
  0x40   :  { %557 = vmatpush.bf16.msrb.mxu0 %v1255_v47  ;;  %v1095_v47 = vld [vmem:[#allocation6 + $0x8] sm:$0xf0] }
  0x41   :  { %570 = vmatpush.bf16.msrb.mxu1 %v1263_v48  ;;  %v1098_v48 = vor.u32 %v1268_v45, %v1095_v47 }
  0x42   :  { %712 = vmatpush.bf16.msra.mxu2 %v1138_v16 }
  0x43   :  { %700 = vmatpush.bf16.msrb.mxu3 %v1126_v20  ;;  %v1293_v20 = vld [vmem:[#allocation7 + $0x48] sm:$0xff] }
  0x44   :  { %558 = vmatpush.bf16.msrb.mxu0 %v1254_v49 }
  0x45   :  { %571 = vmatpush.bf16.msrb.mxu1 %v1262_v50  ;;  %1090 = vmatmul.msk.bf16.vlgmr.msrb.gmra.mxu2 %vm498_vm0, %v101_v54 }
  0x46   :  { %713 = vmatpush.bf16.msra.mxu2 %v1130_v22  ;;  %v1292_v22 = vld [vmem:[#allocation7 + $0x40] sm:$0xff] }
  0x47   :  { %701 = vmatpush.bf16.msrb.mxu3 %v1118_v26 }
  0x48   :  { %559 = vmatpush.bf16.msrb.mxu0 %v1253_v52  ;;  %v1299_v52 = vld [vmem:[#allocation7 + $0x78] sm:$0xff] }
  0x49   :  { %572 = vmatpush.bf16.msrb.mxu1 %v1261_v53 }
  0x4a   :  { %714 = vmatpush.bf16.msra.mxu2 %v1122_v28 }
  0x4b   :  { %702 = vmatpush.bf16.msrb.mxu3 %v1110_v32 }
  0x4c   :  { %560 = vmatpush.bf16.msrb.mxu0 %v1252_v55  ;;  %v1290_v55 = vld [vmem:[#allocation7 + $0x30] sm:$0xff] }
  0x4d   :  { %573 = vmatpush.bf16.msrb.mxu1 %v1260_v56  ;;  %v1298_v56 = vld [vmem:[#allocation7 + $0x70] sm:$0xff] }
  0x4e   :  { %715 = vmatpush.bf16.msra.mxu2 %v1114_v34 }
  0x4f   :  { %703 = vmatpush.bf16.msrb.mxu3 %v1102_v38 }
  0x50   :  { %561 = vmatpush.bf16.msrb.mxu0 %v1251_v57  ;;  %v1308_v57 = vld [vmem:[%s1486_s2] ss:$0 sm:$0xff] }
  0x51   :  { %574 = vmatpush.bf16.msrb.mxu1 %v1259_v58  ;;  %v1289_v58 = vld [vmem:[#allocation7 + $0x28] sm:$0xff] }
  0x52   :  { %716 = vmatpush.bf16.msra.mxu2 %v1106_v42 }
  0x53   :  { %562 = vmatmul.bf16.vlgmr.msrb.gmra.mxu0 %v99_v61  ;;  %704 = vmatpush.bf16.msrb.mxu3 %v1094_v46 }
  0x54   :  { %575 = vmatmul.bf16.vlgmr.msrb.gmra.mxu1 %v100_v62  ;;  %859 = vmatpush.bf16.msra.mxu0 %v1291_v51 }
  0x55   :  { %872 = vmatpush.bf16.msra.mxu1 %v1299_v52 }
  0x56   :  { %717 = vmatpush.bf16.msra.mxu2 %v1098_v48 }
  0x58   :  { %860 = vmatpush.bf16.msra.mxu0 %v1290_v55 }
  0x59   :  { %873 = vmatpush.bf16.msra.mxu1 %v1298_v56 }
  0x5c   :  { %861 = vmatpush.bf16.msra.mxu0 %v1289_v58 }
  0x5d   :  { %874 = vmatpush.bf16.msra.mxu1 %v1297_v59 }
  0x60   :  { %862 = vmatpush.bf16.msra.mxu0 %v1288_v63 }
  0x61   :  { %875 = vmatpush.bf16.msra.mxu1 %v1296_v0 }
  0x64   :  { %863 = vmatpush.bf16.msra.mxu0 %v1287_v2 }
  0x65   :  { %876 = vmatpush.bf16.msra.mxu1 %v1295_v3 }
  0x68   :  { %864 = vmatpush.bf16.msra.mxu0 %v1286_v6 }
  0x69   :  { %877 = vmatpush.bf16.msra.mxu1 %v1294_v7 }
  0x6c   :  { %865 = vmatpush.bf16.msra.mxu0 %v1285_v19 }
  0x6d   :  { %878 = vmatpush.bf16.msra.mxu1 %v1293_v20 }
  0x70   :  { %866 = vmatpush.bf16.msra.mxu0 %v1284_v21 }
  0x71   :  { %879 = vmatpush.bf16.msra.mxu1 %v1292_v22 }
  0xb0   :  { %v511_v40 = vpop.f32.mrf.mxu0 }
  0xb1   :  { %v524_v41 = vpop.f32.mrf.mxu1  ;;  %v512_v60 = vadd.f32 %v1308_v57, %v511_v40 }
  0xb3   :  { %v525_v1 = vadd.f32 %v524_v41, %v512_v60 }
  0xb8   :  { %v513_v49 = vpop.f32.mrf.mxu0  ;;  %v537_v53 = vpop.f32.mrf.mxu2 }
  0xb9   :  { %v526_v50 = vpop.f32.mrf.mxu1  ;;  %v550_v54 = vpop.f32.mrf.mxu3  ;;  %v538_v4 = vadd.f32 %v537_v53, %v525_v1 }
  0xbb   :  { %v551_v8 = vadd.f32 %v550_v54, %v538_v4 }
  0xc0   :  { %v539_v61 = vpop.f32.mrf.mxu2 }
  0xc1   :  { %v552_v62 = vpop.f32.mrf.mxu3 }
  0xc8   :  { %v589_v5 = vpop.f32.mrf.mxu2 }
  0xd0   :  { %v563_v9 = vpop.f32.mrf.mxu0  ;;  %v591_v13 = vpop.f32.mrf.mxu2 }
  0xd1   :  { %v576_v10 = vpop.f32.mrf.mxu1  ;;  %v564_v11 = vadd.f32 %v563_v9, %v551_v8 }
  0xd3   :  { %v577_v12 = vadd.f32 %v576_v10, %v564_v11 }
  0xd5   :  { %v590_v14 = vadd.f32 %v589_v5, %v577_v12 }
  0xd7   :  { %v593_v15 = vmax.f32 %v590_v14, 0.0 }
  0xd8   :  { %v565_v16 = vpop.f32.mrf.mxu0 }
  0xd9   :  { %v578_v17 = vpop.f32.mrf.mxu1  ;;  %v594_v18 = vpack.c.bf16 %v593_v15, %v593_v15 }
  0xdb   :  { %705 = vmatmul.bf16.vlgmr.msrb.gmra.mxu3 %v594_v18  ;;  %718 = vmatmul.bf16.vlgmr.msra.gmra.mxu2 %v594_v18 }
 0x15e   :  { %v706_v26 = vpop.f32.mrf.mxu3  ;;  %v719_v27 = vpop.f32.mrf.mxu2 }
 0x15f   :  { %v707_v28 = vadd.f32 %v706_v26, %v613_v24  ;;  %v720_v29 = vadd.f32 %v719_v27, %v614_v25 }
 0x161   :  { %v723_v30 = vmax.f32 %v707_v28, 0.0  ;;  %v724_v31 = vmax.f32 %v720_v29, 0.0 }
 0x163   :  { %v725_v32 = vpack.c.bf16 %v723_v30, %v723_v30  ;;  %v726_v33 = vpack.c.bf16 %v724_v31, %v724_v31 }
 0x165   :  { %867 = vmatmul.bf16.vlgmr.msra.gmra.mxu0 %v725_v32  ;;  %880 = vmatmul.bf16.vlgmr.msra.gmra.mxu1 %v726_v33 }
 0x166   :  { %v708_v34 = vpop.f32.mrf.mxu3  ;;  %v721_v35 = vpop.f32.mrf.mxu2 }
 0x1e2   :  { %v868_v37 = vpop.f32.mrf.mxu0  ;;  %v881_v38 = vpop.f32.mrf.mxu1 }
 0x1e3   :  { %v869_v39 = vadd.f32 %v1309_v36, %v868_v37 }
 0x1e5   :  { %v882_v40 = vadd.f32 %v881_v38, %v869_v39 }
 0x1e7   :  { %v885_v41 = vpack.c.bf16 %v882_v40, %v882_v40 }
 0x1e9   :  { %886 = vst [vmem:[%s1491_s7] sm:$0xf] %v885_v41 }
 0x1ea   :  { %v870_v42 = vpop.f32.mrf.mxu0  ;;  %v883_v43 = vpop.f32.mrf.mxu1 }
 0x1eb   :  { %891 = vsyncpa [#allocation3], 1 }
 0x1ec   :  { %892 = vsyncpa [#allocation5], 1 }
 0x1ed   :  { %893 = vsyncpa [#allocation8], 1 }

</bundles_post_ra>
